<compile_context>
chip_gen: v7x
topology: tpu7x:2x2x1
jax: 0.10.0
libtpu: 0.0.40
codegen_flags: <defaults>
</compile_context>

<pallas_src>
import functools

import jax
import jax.numpy as jnp
from jax.experimental import pallas as pl
from jax.experimental.pallas import tpu as pltpu

TAU = 0.8
OUT_LANES = 8  # single merged output stream: [y, y1, y2, 0, 0, 0, 0, 0]


def vf_kernel(sim_ref, com_ref, wsim_ref, bsim_ref, wcom_ref, bcom_ref, g_ref,
              out_ref):
    # (TB, D) @ (D, 2) on the MXU; column 0 = fc head, column 1 = pi gate logit.
    ys = jnp.dot(sim_ref[...], wsim_ref[...],
                 preferred_element_type=jnp.float32) + bsim_ref[...]
    yc = jnp.dot(com_ref[...], wcom_ref[...],
                 preferred_element_type=jnp.float32) + bcom_ref[...]

    y1, pi1 = ys[:, 0:1], ys[:, 1:2]
    y2, pi2 = yc[:, 0:1], yc[:, 1:2]

    g = g_ref[...].astype(jnp.float32)
    # 2-class Gumbel-softmax == sigmoid of the scaled perturbed-logit difference:
    #   p1 = softmax([(pi1+g1)/tau, (pi2+g2)/tau])[0] = sigmoid(((pi1+g1)-(pi2+g2))/tau)
    d = ((pi1 + g[:, 0:1]) - (pi2 + g[:, 1:2])) * (1.0 / TAU)
    p1 = 1.0 / (1.0 + jnp.exp(-d))          # exp rides the EUP slot
    y = y2 + p1 * (y1 - y2)

    pad = jnp.zeros((y.shape[0], OUT_LANES - 3), jnp.float32)
    out_ref[...] = jnp.concatenate([y, y1, y2, pad], axis=-1).astype(out_ref.dtype)


def init_params(key, sim_dim, com_dim):
    """nn.Linear default init: U(-1/sqrt(fan_in), 1/sqrt(fan_in))."""
    ks = jax.random.split(key, 8)

    def lin(kw, kb, fan_in):
        bound = 1.0 / jnp.sqrt(fan_in)
        w = jax.random.uniform(kw, (fan_in, 1), jnp.float32, -bound, bound)
        b = jax.random.uniform(kb, (1,), jnp.float32, -bound, bound)
        return w, b

    w_fc1, b_fc1 = lin(ks[0], ks[1], sim_dim)
    w_fc2, b_fc2 = lin(ks[2], ks[3], com_dim)
    w_pi1, b_pi1 = lin(ks[4], ks[5], sim_dim)
    # NOTE: the PyTorch module defines pi2 = Linear(sim_encoder_dim, 1) but
    # applies it to com_encoder_out; this only works when sim_dim == com_dim.
    w_pi2, b_pi2 = lin(ks[6], ks[7], sim_dim)
    return dict(w_fc1=w_fc1, b_fc1=b_fc1, w_fc2=w_fc2, b_fc2=b_fc2,
                w_pi1=w_pi1, b_pi1=b_pi1, w_pi2=w_pi2, b_pi2=b_pi2)


def pack_params(params, compute_dtype=jnp.float32):
    """Pack [fc | pi] once at init (hoisted out of the per-call path).

    Weights are cast to `compute_dtype` (use jnp.bfloat16 if the encoder
    activations are bf16 to halve HBM traffic); biases stay f32.
    """
    w_sim = jnp.concatenate([params["w_fc1"], params["w_pi1"]], axis=1).astype(compute_dtype)
    w_com = jnp.concatenate([params["w_fc2"], params["w_pi2"]], axis=1).astype(compute_dtype)
    b_sim = jnp.concatenate([params["b_fc1"], params["b_pi1"]], axis=0)[None, :].astype(jnp.float32)
    b_com = jnp.concatenate([params["b_fc2"], params["b_pi2"]], axis=0)[None, :].astype(jnp.float32)
    return dict(w_sim=w_sim, b_sim=b_sim, w_com=w_com, b_com=b_com)


@functools.partial(jax.jit, static_argnames=("block_batch",))
def vf_forward(sim, com, packed, gumbel_noise, *, block_batch=512):
    """sim: (B, Ds), com: (B, Dc), gumbel_noise: (B, 2). Returns (y, y1, y2)."""
    B, Ds = sim.shape
    _, Dc = com.shape

    # Batch tile: big enough to hide DMA under compute, small enough that the
    # double-buffered (sim + com + gumbel) tiles stay far under the scoped-VMEM
    # limit on every generation (v5e 16 MiB default, v7x 64 MiB physical).
    tb = min(block_batch, B)
    grid = (pl.cdiv(B, tb),)

    resident = lambda shape: pl.BlockSpec(shape, lambda i: (0, 0))
    tiled = lambda lanes: pl.BlockSpec((tb, lanes), lambda i: (i, 0))

    out = pl.pallas_call(
        vf_kernel,
        out_shape=jax.ShapeDtypeStruct((B, OUT_LANES), jnp.float32),
        grid=grid,
        in_specs=[
            tiled(Ds),           # sim tile            (streams)
            tiled(Dc),           # com tile            (streams)
            resident((Ds, 2)),   # packed sim weights  (VMEM-resident)
            resident((1, 2)),    # packed sim biases
            resident((Dc, 2)),   # packed com weights
            resident((1, 2)),    # packed com biases
            tiled(2),            # gumbel noise        (streams)
        ],
        out_specs=tiled(OUT_LANES),
        compiler_params=pltpu.CompilerParams(
            dimension_semantics=("parallel",),   # lights up v7x's 2nd TC; no-op on v5e/v6e
            vmem_limit_bytes=32 * 1024 * 1024,   # raises v5e's 16 MiB default; safe on v7x
        ),
    )(sim, com, packed["w_sim"], packed["b_sim"],
      packed["w_com"], packed["b_com"], gumbel_noise)

    return out[:, 0:1], out[:, 1:2], out[:, 2:3]


if __name__ == "__main__":
    B = 8
    SIM_DIM = 32
    COM_DIM = 32  # must equal SIM_DIM for the original module's pi2 to be valid

    key = jax.random.PRNGKey(0)
    k_sim, k_com, k_par, k_g = jax.random.split(key, 4)

    sim = jax.random.normal(k_sim, (B, SIM_DIM), jnp.float32)
    com = jax.random.normal(k_com, (B, COM_DIM), jnp.float32)
    raw_params = init_params(k_par, SIM_DIM, COM_DIM)
    packed = pack_params(raw_params)

    # Deterministic Gumbel(0, 1) noise: -log(-log(U)).
    u = jax.random.uniform(k_g, (B, 2), jnp.float32, minval=1e-10, maxval=1.0)
    gumbel = -jnp.log(-jnp.log(u))

    y_pred, y1, y2 = vf_forward(sim, com, packed, gumbel)
    jax.block_until_ready((y_pred, y1, y2))

    # Pure-JAX reference check (matches the PyTorch forward).
    y1_ref = sim @ raw_params["w_fc1"] + raw_params["b_fc1"]
    y2_ref = com @ raw_params["w_fc2"] + raw_params["b_fc2"]
    pi1 = sim @ raw_params["w_pi1"] + raw_params["b_pi1"]
    pi2 = com @ raw_params["w_pi2"] + raw_params["b_pi2"]
    logits = jnp.concatenate([pi1, pi2], axis=-1)
    p = jax.nn.softmax((logits + gumbel) / TAU, axis=-1)
    ypred_ref = jnp.sum(p * jnp.concatenate([y1_ref, y2_ref], axis=-1),
                        axis=-1, keepdims=True)

    assert jnp.allclose(y1, y1_ref, atol=1e-5), "y_pred_1 mismatch"
    assert jnp.allclose(y2, y2_ref, atol=1e-5), "y_pred_2 mismatch"
    assert jnp.allclose(y_pred, ypred_ref, atol=1e-5), "y_pred mismatch"

    print("KERNEL_OK")
</pallas_src>

<mosaic_0001>
module attributes {stable_mosaic.version = 11 : i64} {
  func.func @vf_kernel(%arg0: i32, %arg1: memref<8x32xf32, #tpu.memory_space<vmem>>, %arg2: memref<8x32xf32, #tpu.memory_space<vmem>>, %arg3: memref<32x2xf32, #tpu.memory_space<vmem>>, %arg4: memref<1x2xf32, #tpu.memory_space<vmem>>, %arg5: memref<32x2xf32, #tpu.memory_space<vmem>>, %arg6: memref<1x2xf32, #tpu.memory_space<vmem>>, %arg7: memref<8x2xf32, #tpu.memory_space<vmem>>, %arg8: memref<8x8xf32, #tpu.memory_space<vmem>>) attributes {dimension_semantics = [#tpu.dimension_semantics<parallel>], iteration_bounds = array<i64: 1>, scalar_prefetch = 0 : i64, scratch_operands = 0 : i64, tpu.core_type = #tpu.core_type<tc>, window_params = [{transform_indices = @transform_0, window_bounds = array<i64: 8, 32>}, {transform_indices = @transform_1, window_bounds = array<i64: 8, 32>}, {pipeline_mode = #tpu.pipeline_mode<synchronous>, transform_indices = @transform_2, window_bounds = array<i64: 32, 2>}, {pipeline_mode = #tpu.pipeline_mode<synchronous>, transform_indices = @transform_3, window_bounds = array<i64: 1, 2>}, {pipeline_mode = #tpu.pipeline_mode<synchronous>, transform_indices = @transform_4, window_bounds = array<i64: 32, 2>}, {pipeline_mode = #tpu.pipeline_mode<synchronous>, transform_indices = @transform_5, window_bounds = array<i64: 1, 2>}, {transform_indices = @transform_6, window_bounds = array<i64: 8, 2>}, {transform_indices = @transform_7, window_bounds = array<i64: 8, 8>}]} {
    %c0 = arith.constant 0 : index
    %c0_0 = arith.constant 0 : index
    %0 = vector.load %arg1[%c0, %c0_0] : memref<8x32xf32, #tpu.memory_space<vmem>>, vector<8x32xf32>
    %c0_1 = arith.constant 0 : index
    %c0_2 = arith.constant 0 : index
    %1 = vector.load %arg3[%c0_1, %c0_2] : memref<32x2xf32, #tpu.memory_space<vmem>>, vector<32x2xf32>
    %cst = arith.constant dense<0.000000e+00> : vector<8x2xf32>
    %2 = tpu.matmul %0, %1, %cst {dimension_numbers = #tpu.dot_dimension_numbers<[1], [0], [0], [1], [0, 0, 1, 1], [], []>} : vector<8x32xf32>, vector<32x2xf32>, vector<8x2xf32> -> vector<8x2xf32>
    %c0_3 = arith.constant 0 : index
    %c0_4 = arith.constant 0 : index
    %3 = vector.load %arg4[%c0_3, %c0_4] : memref<1x2xf32, #tpu.memory_space<vmem>>, vector<1x2xf32>
    %4 = vector.broadcast %3 : vector<1x2xf32> to vector<8x2xf32>
    %5 = arith.addf %2, %4 : vector<8x2xf32>
    %c0_5 = arith.constant 0 : index
    %c0_6 = arith.constant 0 : index
    %6 = vector.load %arg2[%c0_5, %c0_6] : memref<8x32xf32, #tpu.memory_space<vmem>>, vector<8x32xf32>
    %c0_7 = arith.constant 0 : index
    %c0_8 = arith.constant 0 : index
    %7 = vector.load %arg5[%c0_7, %c0_8] : memref<32x2xf32, #tpu.memory_space<vmem>>, vector<32x2xf32>
    %cst_9 = arith.constant dense<0.000000e+00> : vector<8x2xf32>
    %8 = tpu.matmul %6, %7, %cst_9 {dimension_numbers = #tpu.dot_dimension_numbers<[1], [0], [0], [1], [0, 0, 1, 1], [], []>} : vector<8x32xf32>, vector<32x2xf32>, vector<8x2xf32> -> vector<8x2xf32>
    %c0_10 = arith.constant 0 : index
    %c0_11 = arith.constant 0 : index
    %9 = vector.load %arg6[%c0_10, %c0_11] : memref<1x2xf32, #tpu.memory_space<vmem>>, vector<1x2xf32>
    %10 = vector.broadcast %9 : vector<1x2xf32> to vector<8x2xf32>
    %11 = arith.addf %8, %10 : vector<8x2xf32>
    %12 = vector.extract_strided_slice %5 {offsets = [0, 0], sizes = [8, 1], strides = [1, 1]} : vector<8x2xf32> to vector<8x1xf32>
    %13 = vector.extract_strided_slice %5 {offsets = [0, 1], sizes = [8, 1], strides = [1, 1]} : vector<8x2xf32> to vector<8x1xf32>
    %14 = vector.extract_strided_slice %11 {offsets = [0, 0], sizes = [8, 1], strides = [1, 1]} : vector<8x2xf32> to vector<8x1xf32>
    %15 = vector.extract_strided_slice %11 {offsets = [0, 1], sizes = [8, 1], strides = [1, 1]} : vector<8x2xf32> to vector<8x1xf32>
    %c0_12 = arith.constant 0 : index
    %c0_13 = arith.constant 0 : index
    %16 = vector.load %arg7[%c0_12, %c0_13] : memref<8x2xf32, #tpu.memory_space<vmem>>, vector<8x2xf32>
    %17 = vector.extract_strided_slice %16 {offsets = [0, 0], sizes = [8, 1], strides = [1, 1]} : vector<8x2xf32> to vector<8x1xf32>
    %18 = arith.addf %13, %17 : vector<8x1xf32>
    %19 = vector.extract_strided_slice %16 {offsets = [0, 1], sizes = [8, 1], strides = [1, 1]} : vector<8x2xf32> to vector<8x1xf32>
    %20 = arith.addf %15, %19 : vector<8x1xf32>
    %21 = arith.subf %18, %20 : vector<8x1xf32>
    %cst_14 = arith.constant 1.250000e+00 : f32
    %22 = vector.broadcast %cst_14 : f32 to vector<8x1xf32>
    %23 = arith.mulf %21, %22 : vector<8x1xf32>
    %cst_15 = arith.constant 0.000000e+00 : f32
    %24 = vector.broadcast %cst_15 : f32 to vector<8x1xf32>
    %25 = arith.subf %24, %23 : vector<8x1xf32>
    %26 = math.exp %25 : vector<8x1xf32>
    %cst_16 = arith.constant 1.000000e+00 : f32
    %27 = vector.broadcast %cst_16 : f32 to vector<8x1xf32>
    %28 = arith.addf %27, %26 : vector<8x1xf32>
    %cst_17 = arith.constant 1.000000e+00 : f32
    %29 = vector.broadcast %cst_17 : f32 to vector<8x1xf32>
    %30 = arith.divf %29, %28 : vector<8x1xf32>
    %31 = arith.subf %12, %14 : vector<8x1xf32>
    %32 = arith.mulf %30, %31 : vector<8x1xf32>
    %33 = arith.addf %14, %32 : vector<8x1xf32>
    %cst_18 = arith.constant 0.000000e+00 : f32
    %34 = vector.broadcast %cst_18 : f32 to vector<8x5xf32>
    %35 = tpu.concatenate %33, %12, %14, %34 in 1 : vector<8x1xf32>, vector<8x1xf32>, vector<8x1xf32>, vector<8x5xf32> -> vector<8x8xf32>
    %c0_19 = arith.constant 0 : index
    %c0_20 = arith.constant 0 : index
    %36 = vector.load %arg8[%c0_19, %c0_20] : memref<8x8xf32, #tpu.memory_space<vmem>>, vector<8x8xf32>
    tpu.vector_store %arg8[%c0_19, %c0_20], %35 {strides = array<i32>} : memref<8x8xf32, #tpu.memory_space<vmem>>, vector<8x8xf32>,
    return
  }
  func.func @transform_0(%arg0: i32) -> (i32, i32) {
    %c0_i32 = arith.constant 0 : i32
    %c0_i32_0 = arith.constant 0 : i32
    return %arg0, %c0_i32 : i32, i32
  }
  func.func @transform_1(%arg0: i32) -> (i32, i32) {
    %c0_i32 = arith.constant 0 : i32
    %c0_i32_0 = arith.constant 0 : i32
    return %arg0, %c0_i32 : i32, i32
  }
  func.func @transform_2(%arg0: i32) -> (i32, i32) {
    %c0_i32 = arith.constant 0 : i32
    %c0_i32_0 = arith.constant 0 : i32
    %c0_i32_1 = arith.constant 0 : i32
    return %c0_i32, %c0_i32_0 : i32, i32
  }
  func.func @transform_3(%arg0: i32) -> (i32, i32) {
    %c0_i32 = arith.constant 0 : i32
    %c0_i32_0 = arith.constant 0 : i32
    %c0_i32_1 = arith.constant 0 : i32
    return %c0_i32, %c0_i32_0 : i32, i32
  }
  func.func @transform_4(%arg0: i32) -> (i32, i32) {
    %c0_i32 = arith.constant 0 : i32
    %c0_i32_0 = arith.constant 0 : i32
    %c0_i32_1 = arith.constant 0 : i32
    return %c0_i32, %c0_i32_0 : i32, i32
  }
  func.func @transform_5(%arg0: i32) -> (i32, i32) {
    %c0_i32 = arith.constant 0 : i32
    %c0_i32_0 = arith.constant 0 : i32
    %c0_i32_1 = arith.constant 0 : i32
    return %c0_i32, %c0_i32_0 : i32, i32
  }
  func.func @transform_6(%arg0: i32) -> (i32, i32) {
    %c0_i32 = arith.constant 0 : i32
    %c0_i32_0 = arith.constant 0 : i32
    return %arg0, %c0_i32 : i32, i32
  }
  func.func @transform_7(%arg0: i32) -> (i32, i32) {
    %c0_i32 = arith.constant 0 : i32
    %c0_i32_0 = arith.constant 0 : i32
    return %arg0, %c0_i32 : i32, i32
  }
}

</mosaic_0001>

<bundles_post_ra>
// kernel: vf_forward.1
= control target key start
LH: loop header
LB: loop body
LE: loop exit
PB: predicated region body
PF: predicated region fallthrough
CT: control target
= control target key end

     0   :  { %v301_v0 = vmov 0.0|0.0   ;;  %vm302_vm0 = vmmov 0   ;;  %v303_v8 = vmov 0.0   ;;  %vm38_vm1 = vcmask 261120   ;;  %s392_s2 = inlined_call_operand.vmem [shape: f32[32,2], index: 2, kind: input, shape index: {}]   ;;  %s393_s4 = inlined_call_operand.vmem [shape: f32[32,2], index: 4, kind: input, shape index: {}]   ;;  %s394_s6 = inlined_call_operand.vmem [shape: f32[8,2], index: 6, kind: input, shape index: {}]   ;;  %s395_s0 = inlined_call_operand.vmem [shape: f32[8,32], index: 0, kind: input, shape index: {}]   ;;  %s396_s1 = inlined_call_operand.vmem [shape: f32[8,32], index: 1, kind: input, shape index: {}]   ;;  %s397_s3 = inlined_call_operand.vmem [shape: f32[1,2], index: 3, kind: input, shape index: {}]   ;;  %s398_s5 = inlined_call_operand.vmem [shape: f32[1,2], index: 5, kind: input, shape index: {}]   ;;  %s399_s7 = inlined_call_operand.vmem [shape: f32[8,8], index: 7, kind: output, shape index: {}]  }
   0x1   :  { %279 = vmatprep.subr.bf16.mxu0 %v301_v0  ;;  %285 = vmatprep.subr.bf16.mxu1 %v301_v0  ;;  %v27_v1 = vld [vmem:[%s392_s2] sm:$0xff]  ;;  %v28_v2 = vld [vmem:[%s392_s2 + $0x8] sm:$0xff]  ;;  %v29_v6 = vld [vmem:[%s392_s2 + $0x10] sm:$0xff]  ;;  %vm231_vm2 = vcmask 7168   ;;  %vm233_vm3 = vcmask 15360   ;;  %vm235_vm4 = vcmask 23552  }
   0x2   :  { %v113_v3 = vld [vmem:[%s393_s4] sm:$0xff]  ;;  %v280_v4 = vpack.c.bf16 %v28_v2, %v27_v1  ;;  %v114_v5 = vld [vmem:[%s393_s4 + $0x8] sm:$0xff]  ;;  %v30_v7 = vld [vmem:[%s392_s2 + $0x18] sm:$0xff]  ;;  %265 = vmatprep.mubr.msk.f32.mxu0 %vm302_vm0, %v303_v8  ;;  %276 = vmatprep.mubr.msk.f32.mxu1 %vm302_vm0, %v303_v8  ;;  %s304_s2 = smov 1   ;;  %vm237_vm5 = vcmask 64512  }
   0x3   :  { %v286_v9 = vpack.c.bf16 %v114_v5, %v113_v3  ;;  %v115_v10 = vld [vmem:[%s393_s4 + $0x10] sm:$0xff]  ;;  %v116_v11 = vld [vmem:[%s393_s4 + $0x18] sm:$0xff]  ;;  %v283_v12 = vpack.c.bf16 %v30_v7, %v29_v6  ;;  %v197_v13 = vld [vmem:[%s394_s6] sm:$0xff] }
   0x4   :  { %281 = vmatpush3.bf16.msra.mxu0 %v280_v4  ;;  %v289_v14 = vpack.c.bf16 %v116_v11, %v115_v10  ;;  %199 = vrot.lane.b32.xlu0 %v197_v13, %s304_s2  ;;  %v26_v15 = vld [vmem:[%s395_s0] sm:$0xff]  ;;  %s305_s0 = smov 2  }
   0x5   :  { %287 = vmatpush3.bf16.msra.mxu1 %v286_v9  ;;  %282 = vmatprep.subr.bf16.mxu0 %v301_v0  ;;  %v112_v16 = vld [vmem:[%s396_s1] sm:$0xff]  ;;  %s306_s1 = smov 127  }
   0x6   :  { %288 = vmatprep.subr.bf16.mxu1 %v301_v0  ;;  %v243_v17 = vld [vmem:[%s397_s3] ss:$0 sm:$0xff] }
   0x7   :  { %v245_v18 = vld [vmem:[%s398_s5] ss:$0 sm:$0xff] }
   0x8   :  { %284 = vmatpush3.bf16.msra.mxu0 %v283_v12 }
   0x9   :  { %290 = vmatpush3.bf16.msra.mxu1 %v289_v14 }
   0xb   :  { %266 = vmatmul.mubr.msk.f32.vlgmr.msra.gmra.mrb[0].mxu0 %vm38_vm1, %v26_v15 }
   0xc   :  { %277 = vmatmul.mubr.msk.f32.vlgmr.msra.gmra.mrb[0].mxu1 %vm38_vm1, %v112_v16 }
  0x76   :  { %v200_v26 = vpop.permute.xlu0 %199 }
  0xde   :  { %v108_v19 = vpop.f32.mrb[0].mxu0 }
  0xdf   :  { %v109_v20 = vadd.f32 %v243_v17, %v108_v19  ;;  %v193_v21 = vpop.f32.mrb[0].mxu1  ;;  %v267_v22 = vpop.f32.mrb[1].mxu0 }
  0xe0   :  { %v194_v23 = vadd.f32 %v245_v18, %v193_v21  ;;  %v278_v24 = vpop.f32.mrb[1].mxu1 }
  0xe1   :  { %v202_v27 = vadd.f32 %v200_v26, %v109_v20 }
  0xe2   :  { %v212_v25 = vsub.f32 %v109_v20, %v194_v23  ;;  %v203_v28 = vadd.f32 %v197_v13, %v194_v23 }
  0xe4   :  { %214 = vrot.lane.b32.xlu0 %v212_v25, %s304_s2  ;;  %v204_v29 = vsub.f32 %v202_v27, %v203_v28 }
  0xe6   :  { %v205_v30 = vmul.f32 1.25, %v204_v29 }
  0xe8   :  { %228 = vrot.lane.b32.xlu0 %v194_v23, %s305_s0  ;;  %v206_v31 = vsub.f32 0.0, %v205_v30 }
  0xea   :  { %v207_v32 = vmul.f32 1.442695, %v206_v31 }
  0xec   :  { %297 = vpow2.f32 %v207_v32 }
  0xf6   :  { %v298_v33 = vpop.eup %297 }
  0xf7   :  { %v209_v34 = vadd.f32 1.0, %v298_v33 }
  0xf9   :  { %299 = vrcp.f32 %v209_v34 }
 0x103   :  { %v300_v35 = vpop.eup %299 }
 0x156   :  { %v215_v36 = vpop.permute.xlu0 %214 }
 0x157   :  { %v217_v37 = vmul.f32 %v300_v35, %v215_v36 }
 0x159   :  { %219 = vrot.lane.b32.xlu1 %v217_v37, %s306_s1 }
 0x15a   :  { %v229_v41 = vpop.permute.xlu0 %228 }
 0x15d   :  { %224 = vrot.lane.b32.xlu1 %v109_v20, %s304_s2 }
 0x1cb   :  { %v220_v38 = vpop.permute.xlu1 %219 }
 0x1cc   :  { %v222_v39 = vadd.f32 %v220_v38, %v194_v23 }
 0x1cf   :  { %v225_v40 = vpop.permute.xlu1 %224 }
 0x1d0   :  { %v232_v42 = vsel %vm231_vm2, %v222_v39, %v225_v40 }
 0x1d1   :  { %v234_v43 = vsel %vm233_vm3, %v232_v42, %v229_v41 }
 0x1d2   :  { %v236_v44 = vsel %vm235_vm4, %v234_v43, 0.0 }
 0x1d3   :  { %238 = vst.msk [vmem:[%s399_s7] sm:$0xff] %vm237_vm5, %v236_v44 }

</bundles_post_ra>
